<compile_context>
chip_gen: v7x
topology: tpu7x:2x2x1
jax: 0.10.0
libtpu: 0.0.40
codegen_flags: <defaults>
</compile_context>

<pallas_src>
import math

import jax
import jax.numpy as jnp
from jax.experimental import pallas as pl
from jax.experimental.pallas import tpu as pltpu


def _round_up(x, m):
    return (x + m - 1) // m * m


def _sublane_multiple(dtype):
    return {4: 8, 2: 16, 1: 32}.get(jnp.dtype(dtype).itemsize, 8)


def token_embedding_kernel(xc_ref, w_ref, o_ref):
    # xc_ref: (TM, 3C)   w_ref: (3C, TD)   o_ref: (TM, TD)
    o_ref[...] = jnp.dot(
        xc_ref[...], w_ref[...], preferred_element_type=jnp.float32
    ).astype(o_ref.dtype)


def token_embedding(x, weight, *, tm=2048, compute_dtype=None, out_dtype=None):
    """x: [B, L, c_in]; weight: torch Conv1d layout [d_model, c_in, 3].

    Returns [B, L, d_model], matching TokenEmbedding.forward (permute, circular
    conv along the sequence axis, transpose back).

    compute_dtype: optionally cast operands (e.g. jnp.bfloat16) before the
    matmul; accumulation stays fp32.  out_dtype: optionally emit a narrower
    output to halve writeback HBM traffic if the downstream graph tolerates it.
    Defaults keep full fp32 semantics of the PyTorch module.
    """
    B, L, C = x.shape
    D = weight.shape[0]
    K = 3 * C
    out_dtype = out_dtype or x.dtype

    # W_flat[k*C + c, o] = W[o, c, k] so that xc @ W_flat == circular conv out,
    # where xc row t is [x[(t-1)%L], x[t], x[(t+1)%L]]  (tap k=0 pairs with t-1).
    w_flat = jnp.transpose(weight, (2, 1, 0)).reshape(K, D)

    # Circular-neighbor ("halo") construction in the wrapper (cheap: K tiny).
    # TODO(synk): for very small B*L, fold the halo into the kernel (per-(B,
    # L-tile) window with pl.when wrap handling) to drop these extra launches.
    xm1 = jnp.roll(x, 1, axis=1)    # row t holds x[(t-1) % L]
    xp1 = jnp.roll(x, -1, axis=1)   # row t holds x[(t+1) % L]
    xc = jnp.concatenate([xm1, x, xp1], axis=-1).reshape(B * L, K)

    if compute_dtype is not None:
        xc = xc.astype(compute_dtype)
        w_flat = w_flat.astype(compute_dtype)

    itemsize = jnp.dtype(xc.dtype).itemsize
    sub = _sublane_multiple(xc.dtype)

    # ---------------- tiling (no padding, no post-call slice) ----------------
    M = B * L

    # d_model axis: keep the whole (K, D) weight resident and the output block
    # full-width whenever reasonable; only tile very large, 128-divisible D,
    # using an exact divisor so no dead columns are ever written.
    TD = D
    if D > 2048 and D % 128 == 0:
        TD = 128
        for cand in range(1024, 127, -128):
            if D % cand == 0:
                TD = cand
                break

    # Row (B*L) axis.
    if M <= sub:
        TM = M                                    # single block == full dim
    else:
        # >= 2 blocks so v7x's two TensorCores both get work on 'parallel' M.
        TM = min(tm, _round_up(pl.cdiv(M, 2), sub))
        # Cap so the double-buffered output tile stays <= ~8 MiB per buffer.
        max_rows = (8 * 1024 * 1024) // max(1, TD * max(itemsize, 4))
        TM = max(sub, min(TM, (max_rows // sub) * sub if max_rows >= sub else sub))

    grid_m = pl.cdiv(M, TM)     # ragged tail: Pallas masks the out-of-bounds writes
    grid_d = pl.cdiv(D, TD)

    # Double-buffered VMEM footprint estimate (inputs + weight + output tiles).
    vmem_bytes = 2 * (TM * K + K * TD + TM * TD) * max(itemsize, 4)
    vmem_limit = int(max(vmem_bytes + (4 << 20), 32 << 20))

    out = pl.pallas_call(
        token_embedding_kernel,
        out_shape=jax.ShapeDtypeStruct((M, D), out_dtype),
        grid_spec=pltpu.PrefetchScalarGridSpec(
            num_scalar_prefetch=0,
            grid=(grid_m, grid_d),
            in_specs=[
                pl.BlockSpec((TM, K), lambda i, j: (i, 0)),
                pl.BlockSpec((K, TD), lambda i, j: (0, j)),   # resident when grid_d == 1
            ],
            out_specs=pl.BlockSpec((TM, TD), lambda i, j: (i, j)),
        ),
        compiler_params=pltpu.CompilerParams(
            dimension_semantics=("parallel", "parallel"),
            vmem_limit_bytes=vmem_limit,
        ),
    )(xc, w_flat)

    return out.reshape(B, L, D)


def _reference(x, weight):
    """Independent reference: real circular conv via lax.conv_general_dilated,
    mirroring torch.nn.Conv1d(k=3, padding=1, padding_mode='circular', bias=False)
    applied to x.permute(0,2,1) and transposed back."""
    xt = jnp.transpose(x, (0, 2, 1))                                   # [B, C, L]
    xt = jnp.concatenate([xt[:, :, -1:], xt, xt[:, :, :1]], axis=-1)   # circular pad
    y = jax.lax.conv_general_dilated(
        xt, weight, window_strides=(1,), padding="VALID",
        dimension_numbers=("NCH", "OIH", "NCH"))                       # [B, D, L]
    return jnp.transpose(y, (0, 2, 1))                                 # [B, L, D]


if __name__ == "__main__":
    B, L, c_in, d_model = 2, 8, 4, 32

    key = jax.random.PRNGKey(0)
    kx, kw = jax.random.split(key)

    # kaiming_normal_(mode='fan_in', nonlinearity='leaky_relu') on Conv1d weight
    fan_in = c_in * 3
    gain = math.sqrt(2.0 / (1.0 + 0.01 ** 2))
    std = gain / math.sqrt(fan_in)
    weight = jax.random.normal(kw, (d_model, c_in, 3), dtype=jnp.float32) * std

    x = jax.random.normal(kx, (B, L, c_in), dtype=jnp.float32)

    out = jax.block_until_ready(token_embedding(x, weight))

    ref = _reference(x, weight)
    assert out.shape == (B, L, d_model)
    assert jnp.allclose(out, ref, atol=1e-5, rtol=1e-5)

    print("KERNEL_OK")
</pallas_src>

<mosaic_0001>
module attributes {stable_mosaic.version = 11 : i64} {
  func.func @token_embedding_kernel(%arg0: i32, %arg1: i32, %arg2: memref<8x12xf32, #tpu.memory_space<vmem>>, %arg3: memref<12x32xf32, #tpu.memory_space<vmem>>, %arg4: memref<8x32xf32, #tpu.memory_space<vmem>>) attributes {dimension_semantics = [#tpu.dimension_semantics<parallel>, #tpu.dimension_semantics<parallel>], iteration_bounds = array<i64: 2, 1>, scalar_prefetch = 0 : i64, scratch_operands = 0 : i64, tpu.core_type = #tpu.core_type<tc>, window_params = [{transform_indices = @transform_0, window_bounds = array<i64: 8, 12>}, {transform_indices = @transform_1, window_bounds = array<i64: 12, 32>}, {transform_indices = @transform_2, window_bounds = array<i64: 8, 32>}]} {
    %c0 = arith.constant 0 : index
    %c0_0 = arith.constant 0 : index
    %0 = vector.load %arg2[%c0, %c0_0] : memref<8x12xf32, #tpu.memory_space<vmem>>, vector<8x12xf32>
    %c0_1 = arith.constant 0 : index
    %c0_2 = arith.constant 0 : index
    %1 = vector.load %arg3[%c0_1, %c0_2] : memref<12x32xf32, #tpu.memory_space<vmem>>, vector<12x32xf32>
    %cst = arith.constant dense<0.000000e+00> : vector<8x32xf32>
    %2 = tpu.matmul %0, %1, %cst {dimension_numbers = #tpu.dot_dimension_numbers<[1], [0], [0], [1], [0, 0, 1, 1], [], []>} : vector<8x12xf32>, vector<12x32xf32>, vector<8x32xf32> -> vector<8x32xf32>
    %c0_3 = arith.constant 0 : index
    %c0_4 = arith.constant 0 : index
    %3 = vector.load %arg4[%c0_3, %c0_4] : memref<8x32xf32, #tpu.memory_space<vmem>>, vector<8x32xf32>
    tpu.vector_store %arg4[%c0_3, %c0_4], %2 {strides = array<i32>} : memref<8x32xf32, #tpu.memory_space<vmem>>, vector<8x32xf32>,
    return
  }
  func.func @transform_0(%arg0: i32, %arg1: i32) -> (i32, i32) {
    %c0_i32 = arith.constant 0 : i32
    %c0_i32_0 = arith.constant 0 : i32
    return %arg0, %c0_i32 : i32, i32
  }
  func.func @transform_1(%arg0: i32, %arg1: i32) -> (i32, i32) {
    %c0_i32 = arith.constant 0 : i32
    %c0_i32_0 = arith.constant 0 : i32
    return %c0_i32, %arg1 : i32, i32
  }
  func.func @transform_2(%arg0: i32, %arg1: i32) -> (i32, i32) {
    %c0_i32 = arith.constant 0 : i32
    return %arg0, %arg1 : i32, i32
  }
}

</mosaic_0001>

<bundles_post_ra>
// kernel: tpu_custom_call.1
= control target key start
LH: loop header
LB: loop body
LE: loop exit
PB: predicated region body
PF: predicated region fallthrough
CT: control target
= control target key end

     0   :  { %7 = vsyncpa [#allocation3], 0  ;;  %s878_s0 = inlined_call_operand.hbm [shape: f32[16,12], index: 0, kind: input, shape index: {}]   ;;  %s879_s1 = inlined_call_operand.hbm [shape: f32[12,32], index: 1, kind: input, shape index: {}]   ;;  %s880_s2 = inlined_call_operand.hbm [shape: f32[16,32], index: 2, kind: output, shape index: {}]  }
   0x1   :  { %9 = vsyncpa [#allocation3 + $0x1], 0 }
   0x2   :  { %10 = vsyncpa [#allocation6], 0 }
   0x3   :  { %11 = vsyncpa [#allocation4], 0 }
   0x4   :  { %13 = vsyncpa [#allocation4 + $0x1], 0  ;;  %s664_s9 = smov 0   ;;  %s666_s10 = smov 0  }
   0x5   :  { %s668_s11 = smov 0   ;;  %s670_s12 = smov 0  }
   0x6   :  { %s672_s13 = smov 0   ;;  %s674_s14 = smov 0  }
   0x7 LB: > { %s384_s15 = sadd.s32 4294967295, %s638_s14   ;;  %s385_s16 = sadd.s32 4294967294, %s638_s14   ;;  %s638_s14 = sphi %s674_s14, %s19_s14   ;;  %s634_s13 = sphi %s672_s13, %s904_s13   ;;  %s630_s12 = sphi %s670_s12, %s903_s12   ;;  %s626_s11 = sphi %s668_s11, %s902_s11   ;;  %s622_s10 = sphi %s666_s10, %s901_s10   ;;  %s618_s9 = sphi %s664_s9, %s900_s9  }
   0x8   : > { %p51_p0 = scmp.ne.s32.totalorder %s622_s10, %s618_s9  ;;  %p698_p1 = scmp.eq.s32.totalorder %s384_s15, 0 }
   0x9   : > { %p702_p2 = scmp.eq.s32.totalorder %s384_s15, 1  ;;  %p109_p3 = scmp.eq.s32.totalorder %s385_s16, 1 }
   0xa   : > { %s885_s17 = scalar_select %p698_p1, 1, 0 }
   0xb   : > { %s886_s18 = scalar_select %p702_p2, 1, 0 }
   0xc   : > { %p708_p4 = por %p698_p1, %p51_p0  ;;  %p386_p5 = scmp.ge.s32.totalorder %s638_s14, 1 }
   0xd   : > { %p713_p6 = por %p109_p3, %p51_p0  ;;  %p116_p7 = scmp.lt.s32.totalorder %s638_s14, 3 }
   0xe   : > { %s887_s19 = scalar_select %p708_p4, 1, 0 }
   0xf   : > { %s888_s20 = scalar_select %p713_p6, 1, 0 }
  0x10   : > { %p718_p8 = pnand %p386_p5, %p116_p7  ;;  %s640_s22 = smov [#allocation5]  }
  0x11   : > { %s130_s23 = sshll.u32 %s640_s22, 4  ;;  %s31_s25 = sadd.s32 1, %s634_s13  ;;  %s131_s23 = int_to_ptr.vmem [resolvable:$true] %s130_s23 }
  0x12   : > { %s889_s21 = scalar_select %p718_p8, 1, 0 }
  0x13   : > { %p423_p9 = pneg %p718_p8  ;;  %s494_s28 = scalar_lea.hbm %s879_s1, 256 }
  0x14   : > { %p495_p12 = scmp.ne.s32.totalorder %s879_s1, %s494_s28  ;;  %p501_p5 = scmp.lt.u32.totalorder %s494_s28, %s879_s1 }
  0x15   : > { %p727_p11 = pnand %p423_p9, %p698_p1 }
  0x17   : > { %p496_p13 = pneg %p727_p11 }
  0x19   : > { %p497_p0 = pnand %p496_p13, %p495_p12 }
  0x1b   : > { %p498_p3 = pneg %p497_p0 }
  0x1d   : > { %p503_p7 = pnand %p501_p5, %p498_p3 }
  0x1f   : > { %506 = shalt.err (!%p503_p7)
}
  0x20   : > { %s507_s5 = scalar_lea.vmem %s131_s23, 256  ;;  %p515_p1 = scmp.lt.s32.totalorder %s131_s23, %s131_s23 }
  0x21   : > { %p508_p9 = scmp.ne.s32.totalorder %s131_s23, %s507_s5  ;;  %p516_p4 = scmp.lt.s32.totalorder %s507_s5, %s507_s5 }
  0x23   : > { %p510_p10 = pnand %p508_p9, %p496_p13  ;;  %p517_p8 = por %p516_p4, %p515_p1 }
  0x25   : > { %p511_p6 = pneg %p510_p10 }
  0x27   : > { %p518_p2 = pnand %p517_p8, %p511_p6 }
  0x29   : > { %521 = shalt.err (!%p518_p2)
}
  0x2a   : > { %s641_s6 = smov 128   ;;  %s642_s7 = smov 8  }
  0x2b   : > { %426 = dma.hbm_to_vmem [thread:$0]  (!%p727_p11), %s879_s1, 256, %s131_s23, [#allocation6], %s641_s6, %s641_s6, %s642_s7  }
  0x2c   : > { %p33_p1 = scmp.ge.s32.totalorder %s31_s25, 2  ;;  %s38_s16 = sadd.s32 1, %s626_s11 }
  0x2d   : > { %p45_p2 = scmp.ne.s32.totalorder %s626_s11, %s622_s10  ;;  %p46_p4 = scmp.eq.s32.totalorder %s638_s14, 0 }
  0x2e   : > { %s906_s25 = smov (%p33_p1, %s31_s25), 0  ;;  %p892_p8 = scmp.ne.s32.totalorder %s886_s18, 0 }
  0x2f   : > { %p754_p6 = por %p46_p4, %p45_p2  ;;  %s35_s24 = ssub.s32 %s634_s13, %s906_s25 }
  0x30   : > { %p760_p10 = por %p892_p8, %p45_p2  ;;  %p436_p12 = scmp.lt.s32.totalorder %s638_s14, 2 }
  0x31   : > { %p36_p11 = scmp.eq.s32.totalorder %s35_s24, 0  ;;  %s144_s23 = sand.u32 1, %s626_s11  }
  0x32   : > { %s389_s27 = sshll.u32 %s144_s23, 3  ;;  %s390_s29 = sshll.u32 %s634_s13, 7 }
  0x33   : > { %s769_s28 = scalar_select %p36_p11, %s626_s11, %s38_s16  }
  0x34   : > { %s775_s4 = scalar_lea.hbm %s878_s0, %s390_s29  ;;  %s148_s18 = scalar_lea.vmem [#allocation2], %s389_s27 }
  0x35   : > { %s155_s5 = sshll.u32 %s148_s18, 4  ;;  %p781_p13 = pnand %p436_p12, %p754_p6  ;;  %s777_s5 = int_to_ptr.vmem [resolvable:$true] %s155_s5 }
  0x36   : > { %s145_s7 = scalar_lea.sflag [#allocation3], %s144_s23  ;;  %s522_s8 = scalar_lea.hbm %s775_s4, 128 }
  0x37   : > { %p523_p0 = scmp.ne.s32.totalorder %s775_s4, %s522_s8  ;;  %p524_p3 = pneg %p781_p13 }
  0x38   : > { %s527_s24 = scalar_lea.hbm %s878_s0, 256  ;;  %p528_p9 = scmp.lt.u32.totalorder %s775_s4, %s878_s0 }
  0x39   : > { %p525_p5 = pnand %p524_p3, %p523_p0  ;;  %p529_p1 = scmp.lt.u32.totalorder %s527_s24, %s522_s8 }
  0x3a   : > { %p531_p4 = scmp.lt.u32.totalorder %s522_s8, %s775_s4 }
  0x3b   : > { %p526_p7 = pneg %p525_p5  ;;  %p530_p2 = por %p529_p1, %p528_p9 }
  0x3d   : > { %p532_p6 = por %p531_p4, %p530_p2 }
  0x3f   : > { %p533_p8 = pnand %p532_p6, %p526_p7 }
  0x41   : > { %536 = shalt.err (!%p533_p8)
}
  0x42   : > { %s537_s23 = scalar_lea.vmem %s777_s5, 128  ;;  %s643_s29 = smov [#allocation2]  }
  0x43   : > { %p538_p12 = scmp.ne.s32.totalorder %s777_s5, %s537_s23  ;;  %s542_s30 = sshll.u32 %s643_s29, 4  ;;  %s543_s30 = int_to_ptr.vmem [resolvable:$false] %s542_s30 }
  0x44   : > { %s544_s3 = scalar_lea.vmem %s543_s30, 256  ;;  %p545_p5 = scmp.lt.s32.totalorder %s777_s5, %s543_s30 }
  0x45   : > { %p540_p11 = pnand %p538_p12, %p524_p3  ;;  %p546_p9 = scmp.lt.s32.totalorder %s544_s3, %s537_s23 }
  0x47   : > { %p541_p0 = pneg %p540_p11  ;;  %p547_p1 = por %p546_p9, %p545_p5 }
  0x49   : > { %p548_p2 = pnand %p547_p1, %p541_p0 }
  0x4b   : > { %551 = shalt.err (!%p548_p2)
}
  0x4c   : > { %430 = dma.hbm_to_vmem [thread:$0]  (!%p781_p13), %s775_s4, 128, %s777_s5, %s145_s7  }
  0x4d   : > { %p895_p7 = scmp.ne.s32.totalorder %s889_s21, 0 }
  0x4e   : > { %s813_s18 = sand.u32 (!%p895_p7), 1, %s622_s10   ;;  %p896_p3 = scmp.ne.s32.totalorder (!%p895_p7), %s887_s19, 0 }
  0x4f   : > { %164 = sbr.rel (%p895_p7) target bundleno = 323 (0x143), region = 28  ;;  %s392_s8 = sshll.u32 (!%p895_p7), %s813_s18, 3 }
  0x50   : > { %s167_s15 = scalar_lea.sflag (!%p895_p7), [#allocation3], %s813_s18  ;;  %s170_s16 = scalar_lea.vmem (!%p895_p7), [#allocation2], %s392_s8 }
  0x56   : > { %605 = dma.done.wait (%p896_p3), %s167_s15, 128  }
  0x57   : > { %607 = vsyncadd (%p896_p3), %s167_s15, 4294967168  ;;  %p897_p4 = scmp.ne.s32.totalorder %s885_s17, 0 }
  0x59   : > { %609 = dma.done.wait (%p897_p4), [#allocation6], 256  }
  0x5a   : > { %611 = vsyncadd (%p897_p4), [#allocation6], 4294967040  ;;  %v644_v0 = vmov 0.0|0.0   ;;  %vm645_vm0 = vmmov 0   ;;  %v646_v1 = vmov 0.0   ;;  %vm202_vm1 = vcmask 1043456  }
  0x5b   : > { %411 = vmatprep.subr.bf16.mxu0 %v644_v0  ;;  %408 = vmatprep.mubr.msk.f32.mxu0 %vm645_vm0, %v646_v1  ;;  %v196_v2 = vld [vmem:[#allocation5] sm:$0xff]  ;;  %v197_v3 = vld [vmem:[#allocation5 + $0x8] sm:$0xf]  ;;  %vm647_vm2 = vmmov 1   ;;  %v195_v5 = vld [vmem:[%s170_s16] sm:$0xff]  ;;  %vm198_vm4 = vcmask 97280  }
  0x5c   : > { %vm413_vm3 = vmpackc.low %vm202_vm1, %vm647_vm2  ;;  %v412_v4 = vpack.c.bf16 %v197_v3, %v196_v2  ;;  %s398_s17 = sshll.u32 %s630_s12, 7  ;;  %s194_s19 = scalar_lea.vmem [#allocation7], %s392_s8  ;;  %vm276_vm5 = vcmask 261120  }
  0x5d   : > { %s293_s21 = sshll.u32 %s194_s19, 4  ;;  %s829_s6 = scalar_lea.hbm %s880_s2, %s398_s17  ;;  %s831_s21 = int_to_ptr.vmem [resolvable:$true] %s293_s21 }
  0x5e   : > { %414 = vmatpush3.bf16.msk.msra.mxu0 %vm413_vm3, %v412_v4  ;;  %s279_s7 = scalar_lea.sflag [#allocation4], %s813_s18  ;;  %s552_s24 = scalar_lea.vmem %s831_s21, 128 }
  0x5f   : > { %p553_p13 = scmp.ne.s32.totalorder %s831_s21, %s552_s24  ;;  %s648_s12 = smov [#allocation7]  }
  0x60   : > { %s556_s22 = sshll.u32 %s648_s12, 4  ;;  %s557_s22 = int_to_ptr.vmem [resolvable:$false] %s556_s22 }
  0x61   : > { %409 = vmatmul.mubr.msk.f32.vlgmr.msra.gmra.mrb[0].mxu0 %vm198_vm4, %v195_v5  ;;  %p554_p6 = pnand %p553_p13, %p760_p10  ;;  %s558_s27 = scalar_lea.vmem %s557_s22, 256 }
  0x62   : > { %p559_p12 = scmp.lt.s32.totalorder %s831_s21, %s557_s22  ;;  %p560_p11 = scmp.lt.s32.totalorder %s558_s27, %s552_s24 }
  0x63   : > { %p555_p8 = pneg %p554_p6 }
  0x64   : > { %p561_p0 = por %p560_p11, %p559_p12 }
  0x66   : > { %p562_p5 = pnand %p561_p0, %p555_p8 }
 0x134   : > { %v272_v6 = vpop.f32.mrb[0].mxu0 }
 0x135   : > { %277 = vst.msk [vmem:[%s194_s19] sm:$0xff] %vm276_vm5, %v272_v6  ;;  %v410_v7 = vpop.f32.mrb[1].mxu0 }
 0x136   : > { %565 = shalt.err (!%p562_p5)
}
 0x137   : > { %s566_s23 = scalar_lea.hbm %s829_s6, 128  ;;  %s570_s3 = scalar_lea.hbm %s880_s2, 256 }
 0x138   : > { %p567_p9 = scmp.ne.s32.totalorder %s829_s6, %s566_s23  ;;  %p571_p7 = scmp.lt.u32.totalorder %s829_s6, %s880_s2 }
 0x139   : > { %p572_p3 = scmp.lt.u32.totalorder %s570_s3, %s566_s23  ;;  %p574_p13 = scmp.lt.u32.totalorder %s566_s23, %s829_s6 }
 0x13a   : > { %p568_p1 = pnand %p567_p9, %p760_p10 }
 0x13b   : > { %p573_p4 = por %p572_p3, %p571_p7 }
 0x13c   : > { %p569_p2 = pneg %p568_p1 }
 0x13d   : > { %p575_p6 = por %p574_p13, %p573_p4 }
 0x13f   : > { %p576_p8 = pnand %p575_p6, %p569_p2 }
 0x141   : > { %579 = shalt.err (!%p576_p8)
}
 0x142   : > { %421 = dma.vmem_to_hbm [thread:$0]  (%p760_p10), %s831_s21, 128, %s829_s6, %s279_s7  }
 0x143 PF: > { %s305_s15 = sand.u32 1, %s618_s9   ;;  %p898_p12 = scmp.ne.s32.totalorder %s888_s20, 0 }
 0x144   : > { %p899_p11 = scmp.ge.s32.totalorder %s638_s14, 2  ;;  %s306_s16 = scalar_lea.sflag [#allocation4], %s305_s15 }
 0x146   : > { %p432_p0 = pnand %p899_p11, %p898_p12 }
 0x148   : > { %613 = dma.done.wait (!%p432_p0), %s306_s16, 128  }
 0x149   : > { %615 = vsyncadd (!%p432_p0), %s306_s16, 4294967168  ;;  %s19_s14 = sadd.s32 1, %s638_s14   ;;  %s900_s9 = smov %s622_s10 }
 0x14a   : > { %p16_p5 = scmp.ge.s32.totalorder %s19_s14, 4   ;;  %s901_s10 = smov %s626_s11 }
 0x14b   : > { %s902_s11 = smov %s769_s28  ;;  %s903_s12 = smov %s634_s13 }
 0x14c   : > { %s904_s13 = smov %s906_s25  ;;  %18 = sbr.rel (!%p16_p5) target bundleno = 7 (0x7), region = 78 }
 0x153   :  { %311 = vsyncpa [#allocation3], 1 }
 0x154   :  { %313 = vsyncpa [#allocation3 + $0x1], 1 }
 0x155   :  { %314 = vsyncpa [#allocation6], 1 }
 0x156   :  { %315 = vsyncpa [#allocation4], 1 }
 0x157   :  { %317 = vsyncpa [#allocation4 + $0x1], 1 }

</bundles_post_ra>
